<compile_context>
chip_gen: v6e
topology: v6e:2x2x1
jax: 0.10.0
libtpu: 0.0.40
codegen_flags: <defaults>
</compile_context>

<pallas_src>
import jax
import jax.numpy as jnp
from jax.experimental import pallas as pl
from jax.experimental.pallas import tpu as pltpu

IN_DIM = 10
H1 = 20        # branch1 hidden
H2 = 50        # branch2 hidden
OUT_DIM = 30
LANE = 128     # vreg lane width: pad feature axes to 128
SUBLANE = 8
MAX_TB = 1024  # max rows per grid step


def _round_up(n, m):
    return ((n + m - 1) // m) * m


def _orderb_kernel(x_ref, p_ref, out_ref):
    """Fused two-branch MLP on one row-tile.

    x_ref  : (TB, 128)  bf16; cols 0..9 = x, rest 0
    p_ref  : (256, 128) bf16; rows 0..127  = stage-1 weights (row 127 = biases)
                              rows 128..255 = stage-2 weights (row 255 = biases)
    out_ref: (TB, 128)  f32;  cols 0..29 hold out1 + out2
    """
    x = x_ref[...]                                   # (TB, 128) bf16
    w1 = p_ref[0:LANE, :]                            # (128, 128) tile-aligned slice
    w2 = p_ref[LANE:2 * LANE, :]                     # (128, 128) tile-aligned slice

    b1 = w1[LANE - 1:LANE, :].astype(jnp.float32)    # (1, 128) stage-1 biases
    b2 = w2[LANE - 1:LANE, :].astype(jnp.float32)    # (1, 128) stage-2 biases

    # hidden cols 0..19  = relu(x @ W1a.T + b1a)   (branch1)
    # hidden cols 20..69 = relu(x @ W2a.T + b2a)   (branch2)
    z1 = jnp.dot(x, w1, preferred_element_type=jnp.float32)
    h = jnp.maximum(z1 + b1, 0.0).astype(jnp.bfloat16)

    # out cols 0..29 = h1 @ W1b.T + h2 @ W2b.T + (b1b + b2b) = out1 + out2
    z2 = jnp.dot(h, w2, preferred_element_type=jnp.float32)
    out_ref[...] = z2 + b2


def pack_params(params):
    """Pack both branches (pre-transposed, bias rows appended) into one bf16
    (256,128) slab.  Call ONCE at init; the result is reused by every forward."""
    w1 = jnp.zeros((LANE, LANE), jnp.float32)
    w1 = w1.at[:IN_DIM, :H1].set(params["w1a"].T)                 # (10,20)
    w1 = w1.at[:IN_DIM, H1:H1 + H2].set(params["w2a"].T)          # (10,50)
    w1 = w1.at[LANE - 1, :H1].set(params["b1a"])                  # stage-1 bias row
    w1 = w1.at[LANE - 1, H1:H1 + H2].set(params["b2a"])

    w2 = jnp.zeros((LANE, LANE), jnp.float32)
    w2 = w2.at[:H1, :OUT_DIM].set(params["w1b"].T)                # (20,30)
    w2 = w2.at[H1:H1 + H2, :OUT_DIM].set(params["w2b"].T)         # (50,30)
    w2 = w2.at[LANE - 1, :OUT_DIM].set(params["b1b"] + params["b2b"])

    return jnp.concatenate([w1, w2], axis=0).astype(jnp.bfloat16)  # (256, 128)


@jax.jit
def orderb_forward(x, p_slab):
    """OrderBTest.forward: branch1(x) + branch2(x). `p_slab` = pack_params(params)."""
    b = x.shape[0]
    tb = min(MAX_TB, _round_up(b, SUBLANE))
    b_pad = _round_up(b, tb)
    n_tiles = b_pad // tb

    # Lane-dense bf16 input slab via a single pad (no bias lane).
    x_pad = jnp.pad(x.astype(jnp.bfloat16),
                    ((0, b_pad - b), (0, LANE - IN_DIM)))

    cost = pl.CostEstimate(
        flops=2 * 2 * b_pad * LANE * LANE,
        transcendentals=0,
        bytes_accessed=(2 * b_pad * LANE        # x (bf16) in
                        + 2 * 2 * LANE * LANE   # params (bf16) in
                        + 4 * b_pad * LANE),    # out (f32)
    )

    out_pad = pl.pallas_call(
        _orderb_kernel,
        out_shape=jax.ShapeDtypeStruct((b_pad, LANE), jnp.float32),
        grid=(n_tiles,),
        in_specs=[
            pl.BlockSpec((tb, LANE), lambda i: (i, 0)),
            pl.BlockSpec((2 * LANE, LANE), lambda i: (0, 0)),   # params resident
        ],
        out_specs=pl.BlockSpec((tb, LANE), lambda i: (i, 0)),
        compiler_params=pltpu.CompilerParams(
            dimension_semantics=("parallel",)),
        cost_estimate=cost,
    )(x_pad, p_slab)
    return out_pad[:b, :OUT_DIM]


def init_params(key):
    """PyTorch nn.Linear-style init (uniform(-1/sqrt(fan_in), 1/sqrt(fan_in)))."""
    ks = jax.random.split(key, 8)

    def lin(kw, kb, fan_in, fan_out):
        bound = 1.0 / jnp.sqrt(jnp.float32(fan_in))
        w = jax.random.uniform(kw, (fan_out, fan_in), jnp.float32, -bound, bound)
        bb = jax.random.uniform(kb, (fan_out,), jnp.float32, -bound, bound)
        return w, bb

    w1a, b1a = lin(ks[0], ks[1], IN_DIM, H1)    # branch1 Linear(10, 20)
    w1b, b1b = lin(ks[2], ks[3], H1, OUT_DIM)   # branch1 Linear(20, 30)
    w2a, b2a = lin(ks[4], ks[5], IN_DIM, H2)    # branch2 Linear(10, 50)
    w2b, b2b = lin(ks[6], ks[7], H2, OUT_DIM)   # branch2 Linear(50, 30)
    return {"w1a": w1a, "b1a": b1a, "w1b": w1b, "b1b": b1b,
            "w2a": w2a, "b2a": b2a, "w2b": w2b, "b2b": b2b}


def _reference(x, p):
    h1 = jnp.maximum(x @ p["w1a"].T + p["b1a"], 0.0)
    o1 = h1 @ p["w1b"].T + p["b1b"]
    h2 = jnp.maximum(x @ p["w2a"].T + p["b2a"], 0.0)
    o2 = h2 @ p["w2b"].T + p["b2b"]
    return o1 + o2


if __name__ == "__main__":
    key = jax.random.PRNGKey(0)
    k_param, k_x = jax.random.split(key)

    batch = 8
    params = init_params(k_param)
    p_slab = pack_params(params)           # packed ONCE, reused every call
    x = jax.random.normal(k_x, (batch, IN_DIM), jnp.float32)

    out = orderb_forward(x, p_slab)
    jax.block_until_ready(out)

    assert out.shape == (batch, OUT_DIM) and out.dtype == jnp.float32
    ref = _reference(x, params)
    max_err = float(jnp.max(jnp.abs(out - ref)))
    # bf16 weights/activations + f32 accumulation: errors stay well below 1e-1.
    assert max_err < 1e-1, f"mismatch vs reference: {max_err}"
    print("KERNEL_OK")
</pallas_src>

<mosaic_0001>
module attributes {stable_mosaic.version = 11 : i64} {
  func.func @_orderb_kernel(%arg0: i32, %arg1: memref<8x128xbf16, #tpu.memory_space<vmem>>, %arg2: memref<256x128xbf16, #tpu.memory_space<vmem>>, %arg3: memref<8x128xf32, #tpu.memory_space<vmem>>) attributes {dimension_semantics = [#tpu.dimension_semantics<parallel>], iteration_bounds = array<i64: 1>, scalar_prefetch = 0 : i64, scratch_operands = 0 : i64, tpu.core_type = #tpu.core_type<tc>, window_params = [{transform_indices = @transform_0, window_bounds = array<i64: 8, 128>}, {pipeline_mode = #tpu.pipeline_mode<synchronous>, transform_indices = @transform_1, window_bounds = array<i64: 256, 128>}, {transform_indices = @transform_2, window_bounds = array<i64: 8, 128>}]} {
    %c0 = arith.constant 0 : index
    %c0_0 = arith.constant 0 : index
    %0 = vector.load %arg1[%c0, %c0_0] : memref<8x128xbf16, #tpu.memory_space<vmem>>, vector<8x128xbf16>
    %c0_1 = arith.constant 0 : index
    %c0_2 = arith.constant 0 : index
    %1 = vector.load %arg2[%c0_1, %c0_2] : memref<256x128xbf16, #tpu.memory_space<vmem>>, vector<128x128xbf16>
    %c128 = arith.constant 128 : index
    %c0_3 = arith.constant 0 : index
    %2 = vector.load %arg2[%c128, %c0_3] : memref<256x128xbf16, #tpu.memory_space<vmem>>, vector<128x128xbf16>
    %3 = vector.extract_strided_slice %1 {offsets = [127, 0], sizes = [1, 128], strides = [1, 1]} : vector<128x128xbf16> to vector<1x128xbf16>
    %4 = arith.extf %3 : vector<1x128xbf16> to vector<1x128xf32>
    %5 = vector.extract_strided_slice %2 {offsets = [127, 0], sizes = [1, 128], strides = [1, 1]} : vector<128x128xbf16> to vector<1x128xbf16>
    %6 = arith.extf %5 : vector<1x128xbf16> to vector<1x128xf32>
    %cst = arith.constant dense<0.000000e+00> : vector<8x128xf32>
    %7 = tpu.matmul %0, %1, %cst {dimension_numbers = #tpu.dot_dimension_numbers<[1], [0], [0], [1], [0, 0, 1, 1], [], []>} : vector<8x128xbf16>, vector<128x128xbf16>, vector<8x128xf32> -> vector<8x128xf32>
    %8 = vector.broadcast %4 : vector<1x128xf32> to vector<8x128xf32>
    %9 = arith.addf %7, %8 : vector<8x128xf32>
    %cst_4 = arith.constant 0.000000e+00 : f32
    %10 = vector.broadcast %cst_4 : f32 to vector<8x128xf32>
    %11 = arith.maximumf %9, %10 : vector<8x128xf32>
    %12 = arith.truncf %11 : vector<8x128xf32> to vector<8x128xbf16>
    %cst_5 = arith.constant dense<0.000000e+00> : vector<8x128xf32>
    %13 = tpu.matmul %12, %2, %cst_5 {dimension_numbers = #tpu.dot_dimension_numbers<[1], [0], [0], [1], [0, 0, 1, 1], [], []>} : vector<8x128xbf16>, vector<128x128xbf16>, vector<8x128xf32> -> vector<8x128xf32>
    %14 = vector.broadcast %6 : vector<1x128xf32> to vector<8x128xf32>
    %15 = arith.addf %13, %14 : vector<8x128xf32>
    %c0_6 = arith.constant 0 : index
    %c0_7 = arith.constant 0 : index
    %16 = vector.load %arg3[%c0_6, %c0_7] : memref<8x128xf32, #tpu.memory_space<vmem>>, vector<8x128xf32>
    tpu.vector_store %arg3[%c0_6, %c0_7], %15 {strides = array<i32>} : memref<8x128xf32, #tpu.memory_space<vmem>>, vector<8x128xf32>,
    return
  }
  func.func @transform_0(%arg0: i32) -> (i32, i32) {
    %c0_i32 = arith.constant 0 : i32
    %c0_i32_0 = arith.constant 0 : i32
    return %arg0, %c0_i32 : i32, i32
  }
  func.func @transform_1(%arg0: i32) -> (i32, i32) {
    %c0_i32 = arith.constant 0 : i32
    %c0_i32_0 = arith.constant 0 : i32
    %c0_i32_1 = arith.constant 0 : i32
    return %c0_i32, %c0_i32_0 : i32, i32
  }
  func.func @transform_2(%arg0: i32) -> (i32, i32) {
    %c0_i32 = arith.constant 0 : i32
    %c0_i32_0 = arith.constant 0 : i32
    return %arg0, %c0_i32 : i32, i32
  }
}

</mosaic_0001>

<bundles_post_ra>
// kernel: orderb_forward.1
= control target key start
LH: loop header
LB: loop body
LE: loop exit
PB: predicated region body
PF: predicated region fallthrough
CT: control target
= control target key end

     0   :  { %7 = vsyncpa [#allocation3], 0  ;;  %s436_s0 = inlined_call_operand.vmem [shape: bf16[8,128], index: 0, kind: input, shape index: {}]   ;;  %s437_s1 = inlined_call_operand.hbm [shape: bf16[256,128], index: 1, kind: input, shape index: {}]   ;;  %s438_s2 = inlined_call_operand.hbm [shape: f32[8,128], index: 2, kind: output, shape index: {}]  }
   0x1   :  { %8 = vsyncpa [#allocation4], 0  ;;  %s406_s9 = smov [#allocation2]  }
   0x2   :  { %s16_s10 = sshll.u32 %s406_s9, 4  ;;  %s17_s10 = int_to_ptr.vmem [resolvable:$true] %s16_s10 }
   0x3   :  { %s370_s11 = scalar_lea.vmem %s17_s10, 2048  ;;  %p375_p1 = scmp.lt.s32.totalorder %s17_s10, %s17_s10 }
   0x4   :  { %p371_p0 = scmp.ne.s32.totalorder %s17_s10, %s370_s11  ;;  %p376_p2 = scmp.lt.s32.totalorder %s370_s11, %s370_s11 }
   0x6   :  { %p377_p3 = por %p376_p2, %p375_p1 }
   0x8   :  { %p378_p4 = pnand %p377_p3, %p371_p0 }
   0xa   :  { %381 = shalt.err (!%p378_p4)
}
   0xb   :  { %s407_s12 = smov 64   ;;  %s408_s13 = smov 4  }
   0xc   :  { %22 = dma.hbm_to_vmem [thread:$0]  %s437_s1, 2048, %s17_s10, [#allocation3], %s407_s12, %s407_s12, %s408_s13  }
   0xd   :  { %402 = dma.done.wait [#allocation3], 2048  }
   0xe   :  { %403 = vsyncadd [#allocation3], 4294965248  ;;  %v409_v0 = vmov 0.0   ;;  %vm410_vm0 = vmmov 0   ;;  %v42_v1 = vld [vmem:[#allocation2 + $0x38] sm:$0xff]   ;;  %v345_v2 = vld [vmem:[#allocation2 + $0x30] sm:$0xff]   ;;  %v62_v18 = vlaneseq }
   0xf   :  { %298 = vmatprep.subr.bf16.mxu0 %v409_v0  ;;  %314 = vmatprep.mubr.msk.bf16.mxu0 %vm410_vm0, %v409_v0  ;;  %v346_v3 = vld [vmem:[#allocation2 + $0x28] sm:$0xff]   ;;  %v58_v4 = vld [vmem:[#allocation2 + $0x78] sm:$0xff]   ;;  %v353_v5 = vld [vmem:[#allocation2 + $0x70] sm:$0xff]   ;;  %v60_v20 = vunpack.c.h.bf16 %v42_v1 }
  0x10   :  { %318 = vmatprep.subr.bf16.mxu1 %v409_v0  ;;  %334 = vmatprep.mubr.msk.bf16.mxu1 %vm410_vm0, %v409_v0  ;;  %v347_v6 = vld [vmem:[#allocation2 + $0x20] sm:$0xff]   ;;  %v354_v7 = vld [vmem:[#allocation2 + $0x68] sm:$0xff]   ;;  %v348_v8 = vld [vmem:[#allocation2 + $0x18] sm:$0xff]   ;;  %v63_v19 = vshrl.u32 %v62_v18, 7  ;;  %v61_v30 = vunpack.c.h.bf16 %v58_v4 }
  0x11   :  { %299 = vmatpush3.bf16.msra.mxu0 %v42_v1  ;;  %319 = vmatpush3.bf16.msra.mxu1 %v58_v4  ;;  %v355_v9 = vld [vmem:[#allocation2 + $0x60] sm:$0xff]   ;;  %v349_v10 = vld [vmem:[#allocation2 + $0x10] sm:$0xff]   ;;  %v356_v11 = vld [vmem:[#allocation2 + $0x58] sm:$0xff]  }
  0x12   :  { %300 = vmatprep.subr.bf16.mxu0 %v409_v0  ;;  %320 = vmatprep.subr.bf16.mxu1 %v409_v0  ;;  %v350_v12 = vld [vmem:[#allocation2 + $0x8] sm:$0xff]   ;;  %v357_v13 = vld [vmem:[#allocation2 + $0x50] sm:$0xff]   ;;  %v351_v14 = vld [vmem:[#allocation2] sm:$0xff]   ;;  %v64_v21 = vsub.s32 7, %v63_v19 }
  0x13   :  { %v27_v15 = vld [vmem:[%s436_s0] sm:$0xf]  ;;  %v358_v16 = vld [vmem:[#allocation2 + $0x48] sm:$0xff]   ;;  %s411_s0 = smov [#allocation5]  }
  0x14   :  { %v359_v17 = vld [vmem:[#allocation2 + $0x40] sm:$0xff]   ;;  %v65_v22 = vrot.slane %v60_v20, %v64_v21  ;;  %v159_v31 = vrot.slane %v61_v30, %v64_v21  ;;  %s255_s17 = sshll.u32 %s411_s0, 4  ;;  %s256_s17 = int_to_ptr.vmem [resolvable:$true] %s255_s17 }
  0x15   :  { %301 = vmatpush3.bf16.msra.mxu0 %v345_v2  ;;  %321 = vmatpush3.bf16.msra.mxu1 %v353_v5  ;;  %s382_s18 = scalar_lea.vmem %s256_s17, 128  ;;  %p387_p6 = scmp.lt.s32.totalorder %s256_s17, %s256_s17 }
  0x16   :  { %302 = vmatprep.subr.bf16.mxu0 %v409_v0  ;;  %322 = vmatprep.subr.bf16.mxu1 %v409_v0  ;;  %p383_p5 = scmp.ne.s32.totalorder %s256_s17, %s382_s18  ;;  %p388_p7 = scmp.lt.s32.totalorder %s382_s18, %s382_s18 }
  0x18   :  { %p389_p8 = por %p388_p7, %p387_p6 }
  0x19   :  { %303 = vmatpush3.bf16.msra.mxu0 %v346_v3  ;;  %323 = vmatpush3.bf16.msra.mxu1 %v354_v7 }
  0x1a   :  { %304 = vmatprep.subr.bf16.mxu0 %v409_v0  ;;  %324 = vmatprep.subr.bf16.mxu1 %v409_v0  ;;  %p390_p9 = pnand %p389_p8, %p383_p5 }
  0x1d   :  { %305 = vmatpush3.bf16.msra.mxu0 %v347_v6  ;;  %325 = vmatpush3.bf16.msra.mxu1 %v355_v9 }
  0x1e   :  { %306 = vmatprep.subr.bf16.mxu0 %v409_v0  ;;  %326 = vmatprep.subr.bf16.mxu1 %v409_v0 }
  0x21   :  { %307 = vmatpush3.bf16.msra.mxu0 %v348_v8  ;;  %327 = vmatpush3.bf16.msra.mxu1 %v356_v11 }
  0x22   :  { %308 = vmatprep.subr.bf16.mxu0 %v409_v0  ;;  %328 = vmatprep.subr.bf16.mxu1 %v409_v0 }
  0x25   :  { %309 = vmatpush3.bf16.msra.mxu0 %v349_v10  ;;  %329 = vmatpush3.bf16.msra.mxu1 %v357_v13 }
  0x26   :  { %310 = vmatprep.subr.bf16.mxu0 %v409_v0  ;;  %330 = vmatprep.subr.bf16.mxu1 %v409_v0 }
  0x29   :  { %311 = vmatpush3.bf16.msra.mxu0 %v350_v12  ;;  %331 = vmatpush3.bf16.msra.mxu1 %v358_v16 }
  0x2a   :  { %312 = vmatprep.subr.bf16.mxu0 %v409_v0  ;;  %332 = vmatprep.subr.bf16.mxu1 %v409_v0 }
  0x2d   :  { %313 = vmatpush3.bf16.msra.mxu0 %v351_v14  ;;  %333 = vmatpush3.bf16.msra.mxu1 %v359_v17 }
  0x30   :  { %315 = vmatmul.mubr.bf16.vlgmr.msra.gmra.mxu0 %v27_v15 }
  0xf0   :  { %v148_v23 = vpop.f32.mrf.mxu0 }
  0xf1   :  { %v149_v24 = vadd.f32 %v148_v23, %v65_v22 }
  0xf2   :  { %v316_v25 = vpop.f32.mrf.mxu0 }
  0xf3   :  { %v154_v26 = vmax.f32 %v149_v24, 0.0 }
  0xf4   :  { %v151_v27 = vpop.f32.mrf.mxu0 }
  0xf5   :  { %v155_v28 = vpack.c.bf16 %v154_v26, %v154_v26 }
  0xf6   :  { %v317_v29 = vpop.f32.mrf.mxu0 }
  0xf7   :  { %335 = vmatmul.mubr.bf16.vlgmr.msra.gmra.mxu1 %v155_v28 }
 0x1b7   :  { %v242_v32 = vpop.f32.mrf.mxu1 }
 0x1b8   :  { %v243_v33 = vadd.f32 %v242_v32, %v159_v31 }
 0x1b9   :  { %v336_v34 = vpop.f32.mrf.mxu1 }
 0x1ba   :  { %248 = vst [vmem:[#allocation5] sm:$0xff] %v243_v33 }
 0x1bb   :  { %v245_v35 = vpop.f32.mrf.mxu1 }
 0x1bc   :  { %393 = shalt.err (!%p390_p9)
}
 0x1bd   :  { %258 = dma.vmem_to_hbm [thread:$0]  %s256_s17, 128, %s438_s2, [#allocation4]   ;;  %v337_v36 = vpop.f32.mrf.mxu1 }
 0x1be   :  { %404 = dma.done.wait [#allocation4], 128  }
 0x1bf   :  { %405 = vsyncadd [#allocation4], 4294967168 }
 0x1c0   :  { %262 = vsyncpa [#allocation3], 1 }
 0x1c1   :  { %263 = vsyncpa [#allocation4], 1 }

</bundles_post_ra>
